<compile_context>
chip_gen: v7x
topology: tpu7x:2x2x1
jax: 0.10.0
libtpu: 0.0.40
codegen_flags: <defaults>
</compile_context>

<pallas_src>
import functools

import jax
import jax.numpy as jnp
from jax.experimental import pallas as pl
from jax.experimental.pallas import tpu as pltpu

LANE = 128     # lane width (last-dim tiling unit)
SUBLANE = 8    # sublane width (second-to-last-dim tiling unit)


def _round_up(n: int, m: int) -> int:
    return ((n + m - 1) // m) * m


def _cdiv(a: int, b: int) -> int:
    return (a + b - 1) // b


# --------------------------------------------------------------------------- #
# Kernel
# --------------------------------------------------------------------------- #
def dnn_kernel(x_ref,
               w1_ref, b1_ref,
               w2_ref, b2_ref,
               w3_ref, b3_ref,
               w4_ref, b4_ref,
               out_ref):
    """Fused 4-layer MLP forward for one batch tile (all operands in VMEM)."""

    def layer(h, w_ref, b_ref, relu):
        # MXU matmul with f32 accumulation; bias + ReLU in f32 on the VPU.
        y = jnp.dot(h.astype(w_ref.dtype), w_ref[...],
                    preferred_element_type=jnp.float32)
        y = y + b_ref[...]
        return jnp.maximum(y, 0.0) if relu else y

    h = x_ref[...]
    h = layer(h, w1_ref, b1_ref, True)
    h = layer(h, w2_ref, b2_ref, True)
    h = layer(h, w3_ref, b3_ref, True)
    h = layer(h, w4_ref, b4_ref, False)
    out_ref[...] = h.astype(out_ref.dtype)


# --------------------------------------------------------------------------- #
# One-time parameter preparation (pad + cast, hoisted out of the forward call)
# --------------------------------------------------------------------------- #
def prepare_params(params, *, weight_dtype=jnp.float32):
    """Pack nn.Linear-style params for the Pallas kernel (call once).

    params: (w1, b1, w2, b2, w3, b3, w4, b4) with wi [in_i, out_i] and
            bi [out_i] or [1, out_i].
    Hidden dims are zero-padded to 128 lanes; the first layer's input dim and
    the last layer's output dim stay unpadded (their BlockSpecs use the full
    array extent).  Zero padding is exact: padded hidden lanes stay 0 through
    bias + ReLU and padded weight rows/cols contribute nothing.
    """
    ws = list(params[0::2])
    bs = list(params[1::2])
    n_layers = len(ws)
    out = []
    for i in range(n_layers):
        k, n = ws[i].shape
        kp = k if i == 0 else _round_up(k, LANE)
        np_ = n if i == n_layers - 1 else _round_up(n, LANE)
        w = jnp.pad(ws[i], ((0, kp - k), (0, np_ - n))).astype(weight_dtype)
        b = jnp.pad(bs[i].reshape(1, -1),
                    ((0, 0), (0, np_ - n))).astype(jnp.float32)  # bias stays f32
        out += [w, b]
    return tuple(out)


def _choose_batch_tile(B: int, block_batch: int) -> int:
    tb = min(block_batch, _round_up(B, SUBLANE))
    # If the whole batch lands in one grid step but is big enough to split,
    # cap the tile at ~half the batch so the "parallel" axis can occupy both
    # v7x TensorCores (one extra cheap grid step on single-TC v5e/v6e).
    if tb >= B and B >= 2 * SUBLANE:
        tb = _round_up(_cdiv(B, 2), SUBLANE)
    # Rebalance so the last tile is not mostly padding.
    n_tiles = _cdiv(B, tb)
    return _round_up(_cdiv(B, n_tiles), SUBLANE)


# --------------------------------------------------------------------------- #
# Forward
# --------------------------------------------------------------------------- #
@functools.partial(jax.jit, static_argnames=("block_batch",))
def dnn_forward(x, prepared, *, block_batch=512):
    """Pallas MLP forward.

    x:        [B, input_size]
    prepared: output of prepare_params() (pre-padded, pre-cast weights/biases).
    Output dtype matches the prepared weight dtype (bf16 path streams bf16 x
    and writes bf16 output to halve HBM traffic; f32 path is exact).
    """
    w1, b1, w2, b2, w3, b3, w4, b4 = prepared
    weight_dtype = w1.dtype
    B, in_size = x.shape
    assert w1.shape[0] == in_size, "x feature dim must match layer-1 input dim"
    out_size = w4.shape[1]

    # ---- batch tiling --------------------------------------------------------
    TB = _choose_batch_tile(B, block_batch)
    Bp = _round_up(B, TB)
    n_tiles = Bp // TB

    # Stream x in the weight dtype (callers can pass bf16 x to skip the cast).
    xs = x if x.dtype == weight_dtype else x.astype(weight_dtype)
    if Bp != B:
        xs = jnp.pad(xs, ((0, Bp - B), (0, 0)))

    # ---- Grid / BlockSpecs ---------------------------------------------------
    # x / out: batch-tiled, feature dims unpadded (full-extent last dim).
    x_spec = pl.BlockSpec((TB, in_size), lambda i: (i, 0))
    out_spec = pl.BlockSpec((TB, out_size), lambda i: (i, 0))
    # Grid-invariant weights/biases: constant index_map -> fetched once and
    # kept VMEM-resident across all batch tiles.
    # TODO(synk): for much larger hidden dims on v7x (64 MiB VMEM), single-
    # buffer these constant blocks / add a K-tiled reduction axis; at the
    # current sizes the double-buffered weight footprint is negligible.
    const = lambda a: pl.BlockSpec(a.shape, lambda i: (0, 0))

    in_specs = [x_spec]
    operands = [xs]
    for w, b in ((w1, b1), (w2, b2), (w3, b3), (w4, b4)):
        in_specs += [const(w), const(b)]
        operands += [w, b]

    # ---- Cost estimate (helps XLA schedule around the call) ------------------
    flops = 2 * Bp * sum(w.shape[0] * w.shape[1] for w in (w1, w2, w3, w4))
    bytes_accessed = (
        xs.size * xs.dtype.itemsize
        + sum(o.size * o.dtype.itemsize for o in operands[1:])
        + Bp * out_size * jnp.dtype(weight_dtype).itemsize
    )
    cost = pl.CostEstimate(flops=flops, transcendentals=0,
                           bytes_accessed=bytes_accessed)

    out = pl.pallas_call(
        dnn_kernel,
        out_shape=jax.ShapeDtypeStruct((Bp, out_size), weight_dtype),
        grid_spec=pltpu.PrefetchScalarGridSpec(
            num_scalar_prefetch=0,
            grid=(n_tiles,),
            in_specs=in_specs,
            out_specs=out_spec,
        ),
        compiler_params=pltpu.CompilerParams(
            # Batch axis is independent -> megacore-shardable on v7x
            # (no-op on single-TC v5e/v6e).
            dimension_semantics=("parallel",),
            # Tiny footprint (<< 32 MiB even at TB=1024); safe on all gens.
            vmem_limit_bytes=32 * 1024 * 1024,
        ),
        cost_estimate=cost,
    )(*operands)

    return out[:B] if Bp != B else out


# --------------------------------------------------------------------------- #
# Init / reference
# --------------------------------------------------------------------------- #
def init_params(key, input_size, hidden_layers, output_size):
    """Deterministic init mimicking nn.Linear's uniform(-1/sqrt(in), 1/sqrt(in))."""
    sizes = [input_size] + list(hidden_layers) + [output_size]
    params = []
    for i in range(4):
        fan_in, fan_out = sizes[i], sizes[i + 1]
        key, kw, kb = jax.random.split(key, 3)
        bound = 1.0 / jnp.sqrt(fan_in)
        w = jax.random.uniform(kw, (fan_in, fan_out), jnp.float32, -bound, bound)
        b = jax.random.uniform(kb, (1, fan_out), jnp.float32, -bound, bound)
        params += [w, b]
    return tuple(params)


def reference_forward(x, params):
    """Pure-JAX reference for correctness checking."""
    w1, b1, w2, b2, w3, b3, w4, b4 = params
    h = jnp.maximum(x @ w1 + b1, 0.0)
    h = jnp.maximum(h @ w2 + b2, 0.0)
    h = jnp.maximum(h @ w3 + b3, 0.0)
    return h @ w4 + b4


if __name__ == "__main__":
    # Shapes consistent with the module: DNN(32, [64, 64, 32], 16), batch=8.
    input_size = 32
    hidden_layers = [64, 64, 32]
    output_size = 16
    batch = 8

    key = jax.random.PRNGKey(0)
    kx, kp, kx2 = jax.random.split(key, 3)
    x = jax.random.normal(kx, (batch, input_size), jnp.float32)
    params = init_params(kp, input_size, hidden_layers, output_size)
    ref = reference_forward(x, params)

    # f32 path: exact (up to f32 accumulation order) match with the reference.
    prepped_f32 = prepare_params(params, weight_dtype=jnp.float32)
    out = jax.block_until_ready(dnn_forward(x, prepped_f32))
    assert out.shape == (batch, output_size)
    assert jnp.allclose(out, ref, atol=1e-4, rtol=1e-4), "f32 mismatch vs reference"

    # bf16 streaming path (bf16 weights/x/output, f32 accumulation). Activations
    # are rounded to bf16 at every layer boundary, so error compounds across
    # the 4 layers -> loose tolerance.
    prepped_bf16 = prepare_params(params, weight_dtype=jnp.bfloat16)
    out_bf16 = jax.block_until_ready(dnn_forward(x, prepped_bf16))
    assert out_bf16.shape == (batch, output_size)
    assert out_bf16.dtype == jnp.bfloat16
    assert jnp.allclose(out_bf16.astype(jnp.float32), ref,
                        atol=1e-1, rtol=1e-1), "bf16 mismatch vs reference"

    # Larger, non-multiple batch: exercises batch-row padding and the two-tile
    # megacore split path.
    batch2 = 300
    x2 = jax.random.normal(kx2, (batch2, input_size), jnp.float32)
    ref2 = reference_forward(x2, params)
    out2 = jax.block_until_ready(dnn_forward(x2, prepped_f32))
    assert out2.shape == (batch2, output_size)
    assert jnp.allclose(out2, ref2, atol=1e-4, rtol=1e-4), "large-batch mismatch"

    print("KERNEL_OK")
</pallas_src>

<mosaic_0001>
module attributes {stable_mosaic.version = 11 : i64} {
  func.func @dnn_kernel(%arg0: i32, %arg1: memref<8x32xf32, #tpu.memory_space<vmem>>, %arg2: memref<32x128xf32, #tpu.memory_space<vmem>>, %arg3: memref<1x128xf32, #tpu.memory_space<vmem>>, %arg4: memref<128x128xf32, #tpu.memory_space<vmem>>, %arg5: memref<1x128xf32, #tpu.memory_space<vmem>>, %arg6: memref<128x128xf32, #tpu.memory_space<vmem>>, %arg7: memref<1x128xf32, #tpu.memory_space<vmem>>, %arg8: memref<128x16xf32, #tpu.memory_space<vmem>>, %arg9: memref<1x16xf32, #tpu.memory_space<vmem>>, %arg10: memref<8x16xf32, #tpu.memory_space<vmem>>) attributes {dimension_semantics = [#tpu.dimension_semantics<parallel>], iteration_bounds = array<i64: 1>, scalar_prefetch = 0 : i64, scratch_operands = 0 : i64, tpu.core_type = #tpu.core_type<tc>, window_params = [{transform_indices = @transform_0, window_bounds = array<i64: 8, 32>}, {pipeline_mode = #tpu.pipeline_mode<synchronous>, transform_indices = @transform_1, window_bounds = array<i64: 32, 128>}, {pipeline_mode = #tpu.pipeline_mode<synchronous>, transform_indices = @transform_2, window_bounds = array<i64: 1, 128>}, {pipeline_mode = #tpu.pipeline_mode<synchronous>, transform_indices = @transform_3, window_bounds = array<i64: 128, 128>}, {pipeline_mode = #tpu.pipeline_mode<synchronous>, transform_indices = @transform_4, window_bounds = array<i64: 1, 128>}, {pipeline_mode = #tpu.pipeline_mode<synchronous>, transform_indices = @transform_5, window_bounds = array<i64: 128, 128>}, {pipeline_mode = #tpu.pipeline_mode<synchronous>, transform_indices = @transform_6, window_bounds = array<i64: 1, 128>}, {pipeline_mode = #tpu.pipeline_mode<synchronous>, transform_indices = @transform_7, window_bounds = array<i64: 128, 16>}, {pipeline_mode = #tpu.pipeline_mode<synchronous>, transform_indices = @transform_8, window_bounds = array<i64: 1, 16>}, {transform_indices = @transform_9, window_bounds = array<i64: 8, 16>}]} {
    %c0 = arith.constant 0 : index
    %c0_0 = arith.constant 0 : index
    %0 = vector.load %arg1[%c0, %c0_0] : memref<8x32xf32, #tpu.memory_space<vmem>>, vector<8x32xf32>
    %c0_1 = arith.constant 0 : index
    %c0_2 = arith.constant 0 : index
    %1 = vector.load %arg2[%c0_1, %c0_2] : memref<32x128xf32, #tpu.memory_space<vmem>>, vector<32x128xf32>
    %cst = arith.constant dense<0.000000e+00> : vector<8x128xf32>
    %2 = tpu.matmul %0, %1, %cst {dimension_numbers = #tpu.dot_dimension_numbers<[1], [0], [0], [1], [0, 0, 1, 1], [], []>} : vector<8x32xf32>, vector<32x128xf32>, vector<8x128xf32> -> vector<8x128xf32>
    %c0_3 = arith.constant 0 : index
    %c0_4 = arith.constant 0 : index
    %3 = vector.load %arg3[%c0_3, %c0_4] : memref<1x128xf32, #tpu.memory_space<vmem>>, vector<1x128xf32>
    %4 = vector.broadcast %3 : vector<1x128xf32> to vector<8x128xf32>
    %5 = arith.addf %2, %4 : vector<8x128xf32>
    %cst_5 = arith.constant 0.000000e+00 : f32
    %6 = vector.broadcast %cst_5 : f32 to vector<8x128xf32>
    %7 = arith.maximumf %5, %6 : vector<8x128xf32>
    %c0_6 = arith.constant 0 : index
    %c0_7 = arith.constant 0 : index
    %8 = vector.load %arg4[%c0_6, %c0_7] : memref<128x128xf32, #tpu.memory_space<vmem>>, vector<128x128xf32>
    %cst_8 = arith.constant dense<0.000000e+00> : vector<8x128xf32>
    %9 = tpu.matmul %7, %8, %cst_8 {dimension_numbers = #tpu.dot_dimension_numbers<[1], [0], [0], [1], [0, 0, 1, 1], [], []>} : vector<8x128xf32>, vector<128x128xf32>, vector<8x128xf32> -> vector<8x128xf32>
    %c0_9 = arith.constant 0 : index
    %c0_10 = arith.constant 0 : index
    %10 = vector.load %arg5[%c0_9, %c0_10] : memref<1x128xf32, #tpu.memory_space<vmem>>, vector<1x128xf32>
    %11 = vector.broadcast %10 : vector<1x128xf32> to vector<8x128xf32>
    %12 = arith.addf %9, %11 : vector<8x128xf32>
    %cst_11 = arith.constant 0.000000e+00 : f32
    %13 = vector.broadcast %cst_11 : f32 to vector<8x128xf32>
    %14 = arith.maximumf %12, %13 : vector<8x128xf32>
    %c0_12 = arith.constant 0 : index
    %c0_13 = arith.constant 0 : index
    %15 = vector.load %arg6[%c0_12, %c0_13] : memref<128x128xf32, #tpu.memory_space<vmem>>, vector<128x128xf32>
    %cst_14 = arith.constant dense<0.000000e+00> : vector<8x128xf32>
    %16 = tpu.matmul %14, %15, %cst_14 {dimension_numbers = #tpu.dot_dimension_numbers<[1], [0], [0], [1], [0, 0, 1, 1], [], []>} : vector<8x128xf32>, vector<128x128xf32>, vector<8x128xf32> -> vector<8x128xf32>
    %c0_15 = arith.constant 0 : index
    %c0_16 = arith.constant 0 : index
    %17 = vector.load %arg7[%c0_15, %c0_16] : memref<1x128xf32, #tpu.memory_space<vmem>>, vector<1x128xf32>
    %18 = vector.broadcast %17 : vector<1x128xf32> to vector<8x128xf32>
    %19 = arith.addf %16, %18 : vector<8x128xf32>
    %cst_17 = arith.constant 0.000000e+00 : f32
    %20 = vector.broadcast %cst_17 : f32 to vector<8x128xf32>
    %21 = arith.maximumf %19, %20 : vector<8x128xf32>
    %c0_18 = arith.constant 0 : index
    %c0_19 = arith.constant 0 : index
    %22 = vector.load %arg8[%c0_18, %c0_19] : memref<128x16xf32, #tpu.memory_space<vmem>>, vector<128x16xf32>
    %cst_20 = arith.constant dense<0.000000e+00> : vector<8x16xf32>
    %23 = tpu.matmul %21, %22, %cst_20 {dimension_numbers = #tpu.dot_dimension_numbers<[1], [0], [0], [1], [0, 0, 1, 1], [], []>} : vector<8x128xf32>, vector<128x16xf32>, vector<8x16xf32> -> vector<8x16xf32>
    %c0_21 = arith.constant 0 : index
    %c0_22 = arith.constant 0 : index
    %24 = vector.load %arg9[%c0_21, %c0_22] : memref<1x16xf32, #tpu.memory_space<vmem>>, vector<1x16xf32>
    %25 = vector.broadcast %24 : vector<1x16xf32> to vector<8x16xf32>
    %26 = arith.addf %23, %25 : vector<8x16xf32>
    %c0_23 = arith.constant 0 : index
    %c0_24 = arith.constant 0 : index
    %27 = vector.load %arg10[%c0_23, %c0_24] : memref<8x16xf32, #tpu.memory_space<vmem>>, vector<8x16xf32>
    tpu.vector_store %arg10[%c0_23, %c0_24], %26 {strides = array<i32>} : memref<8x16xf32, #tpu.memory_space<vmem>>, vector<8x16xf32>,
    return
  }
  func.func @transform_0(%arg0: i32) -> (i32, i32) {
    %c0_i32 = arith.constant 0 : i32
    %c0_i32_0 = arith.constant 0 : i32
    return %arg0, %c0_i32 : i32, i32
  }
  func.func @transform_1(%arg0: i32) -> (i32, i32) {
    %c0_i32 = arith.constant 0 : i32
    %c0_i32_0 = arith.constant 0 : i32
    %c0_i32_1 = arith.constant 0 : i32
    return %c0_i32, %c0_i32_0 : i32, i32
  }
  func.func @transform_2(%arg0: i32) -> (i32, i32) {
    %c0_i32 = arith.constant 0 : i32
    %c0_i32_0 = arith.constant 0 : i32
    %c0_i32_1 = arith.constant 0 : i32
    return %c0_i32, %c0_i32_0 : i32, i32
  }
  func.func @transform_3(%arg0: i32) -> (i32, i32) {
    %c0_i32 = arith.constant 0 : i32
    %c0_i32_0 = arith.constant 0 : i32
    %c0_i32_1 = arith.constant 0 : i32
    return %c0_i32, %c0_i32_0 : i32, i32
  }
  func.func @transform_4(%arg0: i32) -> (i32, i32) {
    %c0_i32 = arith.constant 0 : i32
    %c0_i32_0 = arith.constant 0 : i32
    %c0_i32_1 = arith.constant 0 : i32
    return %c0_i32, %c0_i32_0 : i32, i32
  }
  func.func @transform_5(%arg0: i32) -> (i32, i32) {
    %c0_i32 = arith.constant 0 : i32
    %c0_i32_0 = arith.constant 0 : i32
    %c0_i32_1 = arith.constant 0 : i32
    return %c0_i32, %c0_i32_0 : i32, i32
  }
  func.func @transform_6(%arg0: i32) -> (i32, i32) {
    %c0_i32 = arith.constant 0 : i32
    %c0_i32_0 = arith.constant 0 : i32
    %c0_i32_1 = arith.constant 0 : i32
    return %c0_i32, %c0_i32_0 : i32, i32
  }
  func.func @transform_7(%arg0: i32) -> (i32, i32) {
    %c0_i32 = arith.constant 0 : i32
    %c0_i32_0 = arith.constant 0 : i32
    %c0_i32_1 = arith.constant 0 : i32
    return %c0_i32, %c0_i32_0 : i32, i32
  }
  func.func @transform_8(%arg0: i32) -> (i32, i32) {
    %c0_i32 = arith.constant 0 : i32
    %c0_i32_0 = arith.constant 0 : i32
    %c0_i32_1 = arith.constant 0 : i32
    return %c0_i32, %c0_i32_0 : i32, i32
  }
  func.func @transform_9(%arg0: i32) -> (i32, i32) {
    %c0_i32 = arith.constant 0 : i32
    %c0_i32_0 = arith.constant 0 : i32
    return %arg0, %c0_i32 : i32, i32
  }
}

</mosaic_0001>

<bundles_post_ra>
// kernel: dnn_forward.1
= control target key start
LH: loop header
LB: loop body
LE: loop exit
PB: predicated region body
PF: predicated region fallthrough
CT: control target
= control target key end

     0   :  { %14 = vsyncpa [#allocation3], 0  ;;  %s1021_s0 = inlined_call_operand.vmem [shape: f32[8,32], index: 0, kind: input, shape index: {}]   ;;  %s1022_s1 = inlined_call_operand.hbm [shape: f32[32,128], index: 1, kind: input, shape index: {}]   ;;  %s1023_s2 = inlined_call_operand.vmem [shape: f32[1,128], index: 2, kind: input, shape index: {}]   ;;  %s1024_s3 = inlined_call_operand.vmem [shape: f32[128,128], index: 3, kind: input, shape index: {}]   ;;  %s1025_s4 = inlined_call_operand.vmem [shape: f32[1,128], index: 4, kind: input, shape index: {}]   ;;  %s1026_s5 = inlined_call_operand.hbm [shape: f32[128,128], index: 5, kind: input, shape index: {}]   ;;  %s1027_s6 = inlined_call_operand.vmem [shape: f32[1,128], index: 6, kind: input, shape index: {}]   ;;  %s1028_s7 = inlined_call_operand.vmem [shape: f32[128,16], index: 7, kind: input, shape index: {}]   ;;  %s1029_s8 = inlined_call_operand.vmem [shape: f32[1,16], index: 8, kind: input, shape index: {}]   ;;  %s1030_s9 = inlined_call_operand.hbm [shape: f32[8,16], index: 9, kind: output, shape index: {}]  }
   0x1   :  { %15 = vsyncpa [#allocation6], 0 }
   0x2   :  { %16 = vsyncpa [#allocation4], 0  ;;  %s782_s30 = smov [#allocation2]   ;;  %s710_s13 = scalar_lea.hbm %s1022_s1, 512 }
   0x3   :  { %s24_s10 = sshll.u32 %s782_s30, 4  ;;  %p711_p0 = scmp.ne.s32.totalorder %s1022_s1, %s710_s13  ;;  %s25_s10 = int_to_ptr.vmem [resolvable:$true] %s24_s10 }
   0x4   :  { %p714_p1 = scmp.lt.u32.totalorder %s710_s13, %s1022_s1 }
   0x6   :  { %p716_p2 = pnand %p714_p1, %p711_p0 }
   0x8   :  { %719 = shalt.err (!%p716_p2)
}
   0x9   :  { %s720_s18 = scalar_lea.vmem %s25_s10, 512  ;;  %p725_p4 = scmp.lt.s32.totalorder %s25_s10, %s25_s10 }
   0xa   :  { %p721_p3 = scmp.ne.s32.totalorder %s25_s10, %s720_s18  ;;  %p726_p5 = scmp.lt.s32.totalorder %s720_s18, %s720_s18 }
   0xc   :  { %p727_p6 = por %p726_p5, %p725_p4 }
   0xe   :  { %p728_p7 = pnand %p727_p6, %p721_p3 }
  0x10   :  { %731 = shalt.err (!%p728_p7)
}
  0x11   :  { %s783_s19 = smov 128   ;;  %s784_s20 = smov 8  }
  0x12   :  { %30 = dma.hbm_to_vmem [thread:$0]  %s1022_s1, 512, %s25_s10, [#allocation3], %s783_s19, %s783_s19, %s784_s20  }
  0x13   :  { %s785_s23 = smov [#allocation5]   ;;  %s732_s27 = scalar_lea.hbm %s1026_s5, 2048 }
  0x14   :  { %s42_s24 = sshll.u32 %s785_s23, 4  ;;  %p733_p8 = scmp.ne.s32.totalorder %s1026_s5, %s732_s27  ;;  %s43_s24 = int_to_ptr.vmem [resolvable:$true] %s42_s24 }
  0x15   :  { %p736_p9 = scmp.lt.u32.totalorder %s732_s27, %s1026_s5 }
  0x17   :  { %p738_p10 = pnand %p736_p9, %p733_p8 }
  0x19   :  { %741 = shalt.err (!%p738_p10)
}
  0x1a   :  { %s742_s12 = scalar_lea.vmem %s43_s24, 2048  ;;  %p747_p12 = scmp.lt.s32.totalorder %s43_s24, %s43_s24 }
  0x1b   :  { %p743_p11 = scmp.ne.s32.totalorder %s43_s24, %s742_s12  ;;  %p748_p13 = scmp.lt.s32.totalorder %s742_s12, %s742_s12 }
  0x1d   :  { %p749_p0 = por %p748_p13, %p747_p12 }
  0x1f   :  { %p750_p1 = pnand %p749_p0, %p743_p11 }
  0x21   :  { %753 = shalt.err (!%p750_p1)
}
  0x22   :  { %48 = dma.hbm_to_vmem [thread:$0]  %s1026_s5, 2048, %s43_s24, [#allocation6], %s783_s19, %s783_s19, %s784_s20  }
  0x23   :  { %776 = dma.done.wait [#allocation3], 512  }
  0x24   :  { %777 = vsyncadd [#allocation3], 4294966784 }
  0x25   :  { %778 = dma.done.wait [#allocation6], 2048  }
  0x26   :  { %779 = vsyncadd [#allocation6], 4294965248  ;;  %v786_v0 = vmov 0.0|0.0   ;;  %vm787_vm0 = vmmov 0   ;;  %v788_v1 = vmov 0.0   ;;  %v62_v2 = vld [vmem:[#allocation2] sm:$0xff] }
  0x27   :  { %624 = vmatprep.subr.bf16.mxu0 %v786_v0  ;;  %516 = vmatprep.mubr.msk.f32.mxu0 %vm787_vm0, %v788_v1  ;;  %v63_v3 = vld [vmem:[#allocation2 + $0x8] sm:$0xff]  ;;  %v64_v4 = vld [vmem:[#allocation2 + $0x10] sm:$0xff]  ;;  %v65_v6 = vld [vmem:[#allocation2 + $0x18] sm:$0xff]  ;;  %vm73_vm1 = vcmask 261120   ;;  %s789_s12 = smov [#allocation7]   ;;  %vm429_vm2 = vcmask 130048  }
  0x28   :  { %630 = vmatprep.subr.bf16.mxu1 %v786_v0  ;;  %551 = vmatprep.mubr.msk.f32.mxu1 %vm787_vm0, %v788_v1  ;;  %v625_v5 = vpack.c.bf16 %v63_v3, %v62_v2  ;;  %v148_v7 = vld [vmem:[%s1024_s3] sm:$0xff]  ;;  %v149_v8 = vld [vmem:[%s1024_s3 + $0x8] sm:$0xff]  ;;  %v150_v9 = vld [vmem:[%s1024_s3 + $0x10] sm:$0xff]  ;;  %v628_v11 = vpack.c.bf16 %v65_v6, %v64_v4  ;;  %s437_s1 = sshll.u32 %s789_s12, 4  ;;  %s438_s1 = int_to_ptr.vmem [resolvable:$true] %s437_s1 }
  0x29   :  { %v151_v10 = vld [vmem:[%s1024_s3 + $0x18] sm:$0xff]  ;;  %v631_v12 = vpack.c.bf16 %v149_v8, %v148_v7  ;;  %v152_v14 = vld [vmem:[%s1024_s3 + $0x20] sm:$0xff]  ;;  %v153_v15 = vld [vmem:[%s1024_s3 + $0x28] sm:$0xff]  ;;  %p759_p3 = scmp.lt.s32.totalorder %s438_s1, %s438_s1 }
  0x2a   :  { %626 = vmatpush3.bf16.msra.mxu0 %v625_v5  ;;  %v634_v13 = vpack.c.bf16 %v151_v10, %v150_v9  ;;  %v61_v16 = vld [vmem:[%s1021_s0] sm:$0xff]  ;;  %v637_v17 = vpack.c.bf16 %v153_v15, %v152_v14  ;;  %v154_v18 = vld [vmem:[%s1024_s3 + $0x30] sm:$0xff]  ;;  %v155_v19 = vld [vmem:[%s1024_s3 + $0x38] sm:$0xff] }
  0x2b   :  { %627 = vmatprep.subr.bf16.mxu0 %v786_v0  ;;  %632 = vmatpush3.bf16.msra.mxu1 %v631_v12  ;;  %v640_v20 = vpack.c.bf16 %v155_v19, %v154_v18  ;;  %v156_v21 = vld [vmem:[%s1024_s3 + $0x40] sm:$0xff]  ;;  %v157_v22 = vld [vmem:[%s1024_s3 + $0x48] sm:$0xff]  ;;  %v158_v24 = vld [vmem:[%s1024_s3 + $0x50] sm:$0xff] }
  0x2c   :  { %633 = vmatprep.subr.bf16.mxu1 %v786_v0  ;;  %v643_v23 = vpack.c.bf16 %v157_v22, %v156_v21  ;;  %v159_v25 = vld [vmem:[%s1024_s3 + $0x58] sm:$0xff]  ;;  %v160_v27 = vld [vmem:[%s1024_s3 + $0x60] sm:$0xff]  ;;  %v161_v28 = vld [vmem:[%s1024_s3 + $0x68] sm:$0xff] }
  0x2d   :  { %v646_v26 = vpack.c.bf16 %v159_v25, %v158_v24  ;;  %v649_v29 = vpack.c.bf16 %v161_v28, %v160_v27  ;;  %v162_v30 = vld [vmem:[%s1024_s3 + $0x70] sm:$0xff]  ;;  %v163_v31 = vld [vmem:[%s1024_s3 + $0x78] sm:$0xff]  ;;  %v242_v33 = vld [vmem:[#allocation5] sm:$0xff] }
  0x2e   :  { %629 = vmatpush3.bf16.msra.mxu0 %v628_v11  ;;  %v652_v32 = vpack.c.bf16 %v163_v31, %v162_v30  ;;  %v243_v34 = vld [vmem:[#allocation5 + $0x8] sm:$0xff]  ;;  %v244_v35 = vld [vmem:[#allocation5 + $0x10] sm:$0xff]  ;;  %v245_v37 = vld [vmem:[#allocation5 + $0x18] sm:$0xff] }
  0x2f   :  { %654 = vmatprep.subr.bf16.mxu0 %v786_v0  ;;  %635 = vmatpush3.bf16.msra.mxu1 %v634_v13  ;;  %v655_v36 = vpack.c.bf16 %v243_v34, %v242_v33  ;;  %v658_v38 = vpack.c.bf16 %v245_v37, %v244_v35  ;;  %v246_v39 = vld [vmem:[#allocation5 + $0x20] sm:$0xff]  ;;  %v247_v40 = vld [vmem:[#allocation5 + $0x28] sm:$0xff]  ;;  %v248_v42 = vld [vmem:[#allocation5 + $0x30] sm:$0xff] }
  0x30   :  { %636 = vmatprep.subr.bf16.mxu1 %v786_v0  ;;  %v661_v41 = vpack.c.bf16 %v247_v40, %v246_v39  ;;  %v249_v43 = vld [vmem:[#allocation5 + $0x38] sm:$0xff]  ;;  %v250_v45 = vld [vmem:[#allocation5 + $0x40] sm:$0xff]  ;;  %v251_v46 = vld [vmem:[#allocation5 + $0x48] sm:$0xff] }
  0x31   :  { %517 = vmatmul.mubr.msk.f32.vlgmr.msra.gmra.mrb[0].mxu0 %vm73_vm1, %v61_v16  ;;  %v664_v44 = vpack.c.bf16 %v249_v43, %v248_v42  ;;  %v667_v47 = vpack.c.bf16 %v251_v46, %v250_v45  ;;  %v252_v48 = vld [vmem:[#allocation5 + $0x50] sm:$0xff]  ;;  %v253_v49 = vld [vmem:[#allocation5 + $0x58] sm:$0xff]  ;;  %v254_v51 = vld [vmem:[#allocation5 + $0x60] sm:$0xff] }
  0x32   :  { %586 = vmatprep.mubr.msk.f32.mxu0 %vm787_vm0, %v788_v1  ;;  %656 = vmatpush3.bf16.msra.mxu0 %v655_v36  ;;  %v670_v50 = vpack.c.bf16 %v253_v49, %v252_v48  ;;  %v255_v52 = vld [vmem:[#allocation5 + $0x68] sm:$0xff]  ;;  %v447_v54 = vld [vmem:[%s1023_s2] ss:$0 sm:$0xff]  ;;  %v256_v59 = vld [vmem:[#allocation5 + $0x70] sm:$0xff] }
  0x33   :  { %638 = vmatpush3.bf16.msra.mxu1 %v637_v17  ;;  %657 = vmatprep.subr.bf16.mxu0 %v786_v0  ;;  %v673_v53 = vpack.c.bf16 %v255_v52, %v254_v51  ;;  %v257_v60 = vld [vmem:[#allocation5 + $0x78] sm:$0xff]  ;;  %v336_v62 = vld [vmem:[%s1028_s7] sm:$0xff]  ;;  %v337_v63 = vld [vmem:[%s1028_s7 + $0x8] sm:$0xff] }
  0x34   :  { %639 = vmatprep.subr.bf16.mxu1 %v786_v0  ;;  %v676_v61 = vpack.c.bf16 %v257_v60, %v256_v59  ;;  %v338_v2 = vld [vmem:[%s1028_s7 + $0x10] sm:$0xff]  ;;  %v679_v3 = vpack.c.bf16 %v337_v63, %v336_v62  ;;  %v340_v5 = vld [vmem:[%s1028_s7 + $0x20] sm:$0xff]  ;;  %v341_v6 = vld [vmem:[%s1028_s7 + $0x28] sm:$0xff] }
  0x35   :  { %v685_v7 = vpack.c.bf16 %v341_v6, %v340_v5  ;;  %v342_v8 = vld [vmem:[%s1028_s7 + $0x30] sm:$0xff]  ;;  %v343_v9 = vld [vmem:[%s1028_s7 + $0x38] sm:$0xff]  ;;  %v344_v11 = vld [vmem:[%s1028_s7 + $0x40] sm:$0xff] }
  0x36   :  { %659 = vmatpush3.bf16.msra.mxu0 %v658_v38  ;;  %v688_v10 = vpack.c.bf16 %v343_v9, %v342_v8  ;;  %v345_v12 = vld [vmem:[%s1028_s7 + $0x48] sm:$0xff]  ;;  %v346_v14 = vld [vmem:[%s1028_s7 + $0x50] sm:$0xff]  ;;  %v347_v15 = vld [vmem:[%s1028_s7 + $0x58] sm:$0xff] }
  0x37   :  { %641 = vmatpush3.bf16.msra.mxu1 %v640_v20  ;;  %660 = vmatprep.subr.bf16.mxu0 %v786_v0  ;;  %v691_v13 = vpack.c.bf16 %v345_v12, %v344_v11  ;;  %v694_v16 = vpack.c.bf16 %v347_v15, %v346_v14  ;;  %v348_v17 = vld [vmem:[%s1028_s7 + $0x60] sm:$0xff]  ;;  %v349_v18 = vld [vmem:[%s1028_s7 + $0x68] sm:$0xff]  ;;  %v350_v25 = vld [vmem:[%s1028_s7 + $0x70] sm:$0xff] }
  0x38   :  { %642 = vmatprep.subr.bf16.mxu1 %v786_v0  ;;  %v697_v19 = vpack.c.bf16 %v349_v18, %v348_v17  ;;  %v449_v20 = vld [vmem:[%s1025_s4] ss:$0 sm:$0xff] }
  0x3a   :  { %662 = vmatpush3.bf16.msra.mxu0 %v661_v41 }
  0x3b   :  { %644 = vmatpush3.bf16.msra.mxu1 %v643_v23  ;;  %663 = vmatprep.subr.bf16.mxu0 %v786_v0 }
  0x3c   :  { %645 = vmatprep.subr.bf16.mxu1 %v786_v0 }
  0x3e   :  { %665 = vmatpush3.bf16.msra.mxu0 %v664_v44 }
  0x3f   :  { %647 = vmatpush3.bf16.msra.mxu1 %v646_v26  ;;  %666 = vmatprep.subr.bf16.mxu0 %v786_v0  ;;  %v351_v26 = vld [vmem:[%s1028_s7 + $0x78] sm:$0xff] }
  0x40   :  { %648 = vmatprep.subr.bf16.mxu1 %v786_v0  ;;  %v700_v27 = vpack.c.bf16 %v351_v26, %v350_v25 }
  0x42   :  { %668 = vmatpush3.bf16.msra.mxu0 %v667_v47 }
  0x43   :  { %650 = vmatpush3.bf16.msra.mxu1 %v649_v29  ;;  %669 = vmatprep.subr.bf16.mxu0 %v786_v0 }
  0x44   :  { %651 = vmatprep.subr.bf16.mxu1 %v786_v0 }
  0x46   :  { %671 = vmatpush3.bf16.msra.mxu0 %v670_v50 }
  0x47   :  { %653 = vmatpush3.bf16.msra.mxu1 %v652_v32  ;;  %672 = vmatprep.subr.bf16.mxu0 %v786_v0  ;;  %v451_v32 = vld [vmem:[%s1029_s8] ss:$0 sm:$0xff] }
  0x48   :  { %678 = vmatprep.subr.bf16.mxu1 %v786_v0 }
  0x4a   :  { %674 = vmatpush3.bf16.msra.mxu0 %v673_v53 }
  0x4b   :  { %675 = vmatprep.subr.bf16.mxu0 %v786_v0 }
  0x4e   :  { %677 = vmatpush3.bf16.msra.mxu0 %v676_v61 }
 0x104   :  { %v143_v55 = vpop.f32.mrb[0].mxu0 }
 0x105   :  { %v144_v56 = vadd.f32 %v447_v54, %v143_v55  ;;  %v518_v57 = vpop.f32.mrb[1].mxu0 }
 0x107   :  { %v147_v58 = vmax.f32 %v144_v56, 0.0 }
 0x109   :  { %552 = vmatmul.mubr.f32.vlgmr.msra.gmra.mrb[0].mxu1 %v147_v58 }
 0x10a   :  { %621 = vmatprep.mubr.msk.f32.mxu1 %vm787_vm0, %v788_v1  ;;  %v339_v1 = vld [vmem:[%s1028_s7 + $0x18] sm:$0xff]  ;;  %680 = vmatpush3.bf16.msra.mxu1 %v679_v3  ;;  %s754_s7 = scalar_lea.vmem %s438_s1, 128 }
 0x10b   :  { %v682_v4 = vpack.c.bf16 %v339_v1, %v338_v2  ;;  %681 = vmatprep.subr.bf16.mxu1 %v786_v0  ;;  %p755_p2 = scmp.ne.s32.totalorder %s438_s1, %s754_s7  ;;  %p760_p4 = scmp.lt.s32.totalorder %s754_s7, %s754_s7 }
 0x10d   :  { %p761_p5 = por %p760_p4, %p759_p3 }
 0x10e   :  { %683 = vmatpush3.bf16.msra.mxu1 %v682_v4 }
 0x10f   :  { %684 = vmatprep.subr.bf16.mxu1 %v786_v0  ;;  %p762_p6 = pnand %p761_p5, %p755_p2 }
 0x112   :  { %686 = vmatpush3.bf16.msra.mxu1 %v685_v7 }
 0x113   :  { %687 = vmatprep.subr.bf16.mxu1 %v786_v0 }
 0x116   :  { %689 = vmatpush3.bf16.msra.mxu1 %v688_v10 }
 0x117   :  { %690 = vmatprep.subr.bf16.mxu1 %v786_v0 }
 0x11a   :  { %692 = vmatpush3.bf16.msra.mxu1 %v691_v13 }
 0x11b   :  { %693 = vmatprep.subr.bf16.mxu1 %v786_v0 }
 0x11e   :  { %695 = vmatpush3.bf16.msra.mxu1 %v694_v16 }
 0x11f   :  { %696 = vmatprep.subr.bf16.mxu1 %v786_v0 }
 0x122   :  { %698 = vmatpush3.bf16.msra.mxu1 %v697_v19 }
 0x123   :  { %699 = vmatprep.subr.bf16.mxu1 %v786_v0  ;;  %v450_v0 = vld [vmem:[%s1027_s6] ss:$0 sm:$0xff] }
 0x126   :  { %701 = vmatpush3.bf16.msra.mxu1 %v700_v27 }
 0x1dc   :  { %v237_v21 = vpop.f32.mrb[0].mxu1 }
 0x1dd   :  { %v238_v22 = vadd.f32 %v449_v20, %v237_v21  ;;  %v553_v23 = vpop.f32.mrb[1].mxu1 }
 0x1df   :  { %v241_v24 = vmax.f32 %v238_v22, 0.0 }
 0x1e1   :  { %587 = vmatmul.mubr.f32.vlgmr.msra.gmra.mrb[2].mxu0 %v241_v24 }
 0x2b4   :  { %v331_v28 = vpop.f32.mrb[2].mxu0 }
 0x2b5   :  { %v332_v29 = vadd.f32 %v450_v0, %v331_v28  ;;  %v588_v30 = vpop.f32.mrb[3].mxu0 }
 0x2b7   :  { %v335_v31 = vmax.f32 %v332_v29, 0.0 }
 0x2b9   :  { %622 = vmatmul.mubr.f32.vlgmr.msra.gmra.mrb[2].mxu1 %v335_v31 }
 0x38c   :  { %v425_v33 = vpop.f32.mrb[2].mxu1 }
 0x38d   :  { %v426_v34 = vadd.f32 %v451_v32, %v425_v33  ;;  %v623_v35 = vpop.f32.mrb[3].mxu1 }
 0x38f   :  { %430 = vst.msk [vmem:[#allocation7] sm:$0xff] %vm429_vm2, %v426_v34 }
 0x390   :  { %765 = shalt.err (!%p762_p6)
}
 0x391   :  { %s766_s5 = scalar_lea.hbm %s1030_s9, 128 }
 0x392   :  { %p767_p7 = scmp.ne.s32.totalorder %s1030_s9, %s766_s5  ;;  %p770_p8 = scmp.lt.u32.totalorder %s766_s5, %s1030_s9 }
 0x394   :  { %p772_p9 = pnand %p770_p8, %p767_p7 }
 0x396   :  { %775 = shalt.err (!%p772_p9)
}
 0x397   :  { %440 = dma.vmem_to_hbm [thread:$0]  %s438_s1, 128, %s1030_s9, [#allocation4]  }
 0x398   :  { %780 = dma.done.wait [#allocation4], 128  }
 0x399   :  { %781 = vsyncadd [#allocation4], 4294967168 }
 0x39a   :  { %444 = vsyncpa [#allocation3], 1 }
 0x39b   :  { %445 = vsyncpa [#allocation6], 1 }
 0x39c   :  { %446 = vsyncpa [#allocation4], 1 }

</bundles_post_ra>
